<compile_context>
chip_gen: v6e
topology: v6e:2x2x1
jax: 0.10.0
libtpu: 0.0.40
codegen_flags: <defaults>
</compile_context>

<pallas_src>
import functools

import numpy as np
import jax
import jax.numpy as jnp
from jax.experimental import pallas as pl
from jax.experimental.pallas import tpu as pltpu


def _round_up(x, m):
    return (x + m - 1) // m * m


def _wscaled_conv_kernel(x_ref, w_ref, b_ref, o_ref, *, k, wp):
    """One (batch, cout-tile) grid step.

    x_ref: (1, Cin, L)     padded input, flattened spatial on the lane axis
    w_ref: (K*K, CT, Cin)  He-scaled weights, tap-major
    b_ref: (CT, 1)         bias (f32)
    o_ref: (1, CT, L)      output, flattened spatial on the lane axis
    """
    lanes = o_ref.shape[2]
    ct = o_ref.shape[1]
    x = x_ref[0]                                   # (Cin, L), f32 or bf16
    acc = jnp.zeros((ct, lanes), jnp.float32)
    for kh in range(k):                            # static unroll over conv taps
        for kw in range(k):
            t = kh * k + kw
            s = kh * wp + kw                       # flat tap offset
            # (CT, Cin) x (Cin, L) -> (CT, L), f32 accumulation on the MXU.
            y = jnp.dot(w_ref[t], x, preferred_element_type=jnp.float32)
            if s:
                # acc[:, j] += y[:, j + s]: left-rotate by s (as a positive
                # shift of L - s).  The circular wrap only lands on flat
                # positions the wrapper discards, so it is harmless.
                y = pltpu.roll(y, lanes - s, axis=1)
            acc = acc + y
    # Bias add fused into the final (lane-dense) store; everything in f32.
    o_ref[0] = (acc + b_ref[...]).astype(o_ref.dtype)


def wscaled_conv(x, w, bias, *, stride=1, padding=1, compute_dtype=None):
    """WScaledConv.forward: F.conv2d(x, w * scale, bias, stride, padding)."""
    if stride != 1:
        # TODO(synk): stride > 1 needs a strided gather of the flattened output
        # positions; only the module's default stride=1 path is implemented.
        raise NotImplementedError("wscaled_conv Pallas kernel supports stride=1 only")

    B, Cin, H, W = x.shape
    Cout, _, K, _ = w.shape
    scale = (2.0 / (K * K * Cin)) ** 0.5
    Hp, Wp = H + 2 * padding, W + 2 * padding
    Ho, Wo = Hp - K + 1, Wp - K + 1
    L = _round_up(Hp * Wp, 128)          # lane-dense flattened spatial width

    cdt = jnp.dtype(compute_dtype) if compute_dtype is not None else x.dtype

    # Cheap XLA glue (no transpose, no im2col): pad spatially, flatten HxW into
    # the lane axis, zero-pad the lane axis to a multiple of 128.
    xp = jnp.pad(x, ((0, 0), (0, 0), (padding, padding), (padding, padding)))
    x_flat = xp.reshape(B, Cin, Hp * Wp)
    x_flat = jnp.pad(x_flat, ((0, 0), (0, 0), (0, L - Hp * Wp))).astype(cdt)

    # (Cout, Cin, K, K) -> (K*K, Cout, Cin), He scale folded into the weights.
    w_taps = (jnp.transpose(w, (2, 3, 0, 1)).reshape(K * K, Cout, Cin)
              * scale).astype(cdt)
    b2 = bias.reshape(Cout, 1).astype(jnp.float32)

    # Cout tiling: full Cout unless it is large; gives a second parallel grid
    # axis (useful for v7x's 2 TensorCores when B is small).
    if Cout % 256 == 0:
        ct = 256
    elif Cout % 128 == 0:
        ct = 128
    else:
        ct = Cout

    kernel = functools.partial(_wscaled_conv_kernel, k=K, wp=Wp)
    out = pl.pallas_call(
        kernel,
        out_shape=jax.ShapeDtypeStruct((B, Cout, L), x.dtype),
        grid_spec=pltpu.PrefetchScalarGridSpec(
            num_scalar_prefetch=0,
            grid=(B, Cout // ct),
            in_specs=[
                pl.BlockSpec((1, Cin, L), lambda b, c: (b, 0, 0)),
                pl.BlockSpec((K * K, ct, Cin), lambda b, c: (0, c, 0)),
                pl.BlockSpec((ct, 1), lambda b, c: (c, 0)),
            ],
            out_specs=pl.BlockSpec((1, ct, L), lambda b, c: (b, c, 0)),
        ),
        compiler_params=pltpu.CompilerParams(
            dimension_semantics=("parallel", "parallel")),
    )(x_flat, w_taps, b2)

    # Flat index ho*Wp + wo -> (Ho, Wp) -> drop the Wp-Wo halo columns.
    # Output is already NCHW-ordered; no transpose needed.
    out = out[:, :, : Ho * Wp].reshape(B, Cout, Ho, Wp)[:, :, :, :Wo]
    return out


if __name__ == "__main__":
    # Deterministic parameter init mirroring the PyTorch module:
    #   w = randn(outs, ins, k, k); bias = zeros(outs)
    B, INS, OUTS, H, W, K = 2, 4, 8, 16, 16, 3
    key = jax.random.PRNGKey(0)
    kx, kwt = jax.random.split(key)
    x = jax.random.normal(kx, (B, INS, H, W), dtype=jnp.float32)
    w = jax.random.normal(kwt, (OUTS, INS, K, K), dtype=jnp.float32)
    bias = jnp.zeros((OUTS,), dtype=jnp.float32)

    # f32 path.
    out = jax.block_until_ready(wscaled_conv(x, w, bias, stride=1, padding=1))

    # Pure-JAX reference.
    scale = (2.0 / (K * K * INS)) ** 0.5
    ref = jax.lax.conv_general_dilated(
        x, w * scale,
        window_strides=(1, 1),
        padding=[(1, 1), (1, 1)],
        dimension_numbers=("NCHW", "OIHW", "NCHW"),
    ) + bias[None, :, None, None]

    np.testing.assert_allclose(np.asarray(out), np.asarray(ref),
                               rtol=1e-4, atol=1e-4)
    assert out.shape == (B, OUTS, H, W)

    # bf16 MXU operands with f32 accumulation (v6e/v7x fast path); looser tol.
    out_bf16 = jax.block_until_ready(
        wscaled_conv(x, w, bias, stride=1, padding=1,
                     compute_dtype=jnp.bfloat16))
    np.testing.assert_allclose(np.asarray(out_bf16), np.asarray(ref),
                               rtol=5e-2, atol=5e-2)

    print("KERNEL_OK")
</pallas_src>

<mosaic_0001>
module attributes {stable_mosaic.version = 11 : i64} {
  func.func @_wscaled_conv_kernel(%arg0: i32, %arg1: i32, %arg2: memref<1x4x384xf32, #tpu.memory_space<vmem>>, %arg3: memref<9x8x4xf32, #tpu.memory_space<vmem>>, %arg4: memref<8x1xf32, #tpu.memory_space<vmem>>, %arg5: memref<1x8x384xf32, #tpu.memory_space<vmem>>) attributes {dimension_semantics = [#tpu.dimension_semantics<parallel>, #tpu.dimension_semantics<parallel>], iteration_bounds = array<i64: 2, 1>, scalar_prefetch = 0 : i64, scratch_operands = 0 : i64, tpu.core_type = #tpu.core_type<tc>, window_params = [{transform_indices = @transform_0, window_bounds = array<i64: 1, 4, 384>}, {transform_indices = @transform_1, window_bounds = array<i64: 9, 8, 4>}, {transform_indices = @transform_2, window_bounds = array<i64: 8, 1>}, {transform_indices = @transform_3, window_bounds = array<i64: 1, 8, 384>}]} {
    %c0 = arith.constant 0 : index
    %c0_0 = arith.constant 0 : index
    %c0_1 = arith.constant 0 : index
    %0 = vector.load %arg2[%c0, %c0_0, %c0_1] : memref<1x4x384xf32, #tpu.memory_space<vmem>>, vector<1x4x384xf32>
    %1 = vector.shape_cast %0 : vector<1x4x384xf32> to vector<4x384xf32>
    %cst = arith.constant 0.000000e+00 : f32
    %2 = vector.broadcast %cst : f32 to vector<8x384xf32>
    %c0_2 = arith.constant 0 : index
    %c0_3 = arith.constant 0 : index
    %c0_4 = arith.constant 0 : index
    %3 = vector.load %arg3[%c0_2, %c0_3, %c0_4] : memref<9x8x4xf32, #tpu.memory_space<vmem>>, vector<1x8x4xf32>
    %4 = vector.shape_cast %3 : vector<1x8x4xf32> to vector<8x4xf32>
    %cst_5 = arith.constant dense<0.000000e+00> : vector<8x384xf32>
    %5 = tpu.matmul %4, %1, %cst_5 {dimension_numbers = #tpu.dot_dimension_numbers<[1], [0], [0], [1], [0, 0, 1, 1], [], []>} : vector<8x4xf32>, vector<4x384xf32>, vector<8x384xf32> -> vector<8x384xf32>
    %6 = arith.addf %2, %5 : vector<8x384xf32>
    %c1 = arith.constant 1 : index
    %c0_6 = arith.constant 0 : index
    %c0_7 = arith.constant 0 : index
    %7 = vector.load %arg3[%c1, %c0_6, %c0_7] : memref<9x8x4xf32, #tpu.memory_space<vmem>>, vector<1x8x4xf32>
    %8 = vector.shape_cast %7 : vector<1x8x4xf32> to vector<8x4xf32>
    %cst_8 = arith.constant dense<0.000000e+00> : vector<8x384xf32>
    %9 = tpu.matmul %8, %1, %cst_8 {dimension_numbers = #tpu.dot_dimension_numbers<[1], [0], [0], [1], [0, 0, 1, 1], [], []>} : vector<8x4xf32>, vector<4x384xf32>, vector<8x384xf32> -> vector<8x384xf32>
    %c383_i32 = arith.constant 383 : i32
    %10 = tpu.dynamic_rotate %9 by %c383_i32 dim 1 : vector<8x384xf32>, i32 -> vector<8x384xf32>
    %11 = arith.addf %6, %10 : vector<8x384xf32>
    %c2 = arith.constant 2 : index
    %c0_9 = arith.constant 0 : index
    %c0_10 = arith.constant 0 : index
    %12 = vector.load %arg3[%c2, %c0_9, %c0_10] : memref<9x8x4xf32, #tpu.memory_space<vmem>>, vector<1x8x4xf32>
    %13 = vector.shape_cast %12 : vector<1x8x4xf32> to vector<8x4xf32>
    %cst_11 = arith.constant dense<0.000000e+00> : vector<8x384xf32>
    %14 = tpu.matmul %13, %1, %cst_11 {dimension_numbers = #tpu.dot_dimension_numbers<[1], [0], [0], [1], [0, 0, 1, 1], [], []>} : vector<8x4xf32>, vector<4x384xf32>, vector<8x384xf32> -> vector<8x384xf32>
    %c382_i32 = arith.constant 382 : i32
    %15 = tpu.dynamic_rotate %14 by %c382_i32 dim 1 : vector<8x384xf32>, i32 -> vector<8x384xf32>
    %16 = arith.addf %11, %15 : vector<8x384xf32>
    %c3 = arith.constant 3 : index
    %c0_12 = arith.constant 0 : index
    %c0_13 = arith.constant 0 : index
    %17 = vector.load %arg3[%c3, %c0_12, %c0_13] : memref<9x8x4xf32, #tpu.memory_space<vmem>>, vector<1x8x4xf32>
    %18 = vector.shape_cast %17 : vector<1x8x4xf32> to vector<8x4xf32>
    %cst_14 = arith.constant dense<0.000000e+00> : vector<8x384xf32>
    %19 = tpu.matmul %18, %1, %cst_14 {dimension_numbers = #tpu.dot_dimension_numbers<[1], [0], [0], [1], [0, 0, 1, 1], [], []>} : vector<8x4xf32>, vector<4x384xf32>, vector<8x384xf32> -> vector<8x384xf32>
    %c366_i32 = arith.constant 366 : i32
    %20 = tpu.dynamic_rotate %19 by %c366_i32 dim 1 : vector<8x384xf32>, i32 -> vector<8x384xf32>
    %21 = arith.addf %16, %20 : vector<8x384xf32>
    %c4 = arith.constant 4 : index
    %c0_15 = arith.constant 0 : index
    %c0_16 = arith.constant 0 : index
    %22 = vector.load %arg3[%c4, %c0_15, %c0_16] : memref<9x8x4xf32, #tpu.memory_space<vmem>>, vector<1x8x4xf32>
    %23 = vector.shape_cast %22 : vector<1x8x4xf32> to vector<8x4xf32>
    %cst_17 = arith.constant dense<0.000000e+00> : vector<8x384xf32>
    %24 = tpu.matmul %23, %1, %cst_17 {dimension_numbers = #tpu.dot_dimension_numbers<[1], [0], [0], [1], [0, 0, 1, 1], [], []>} : vector<8x4xf32>, vector<4x384xf32>, vector<8x384xf32> -> vector<8x384xf32>
    %c365_i32 = arith.constant 365 : i32
    %25 = tpu.dynamic_rotate %24 by %c365_i32 dim 1 : vector<8x384xf32>, i32 -> vector<8x384xf32>
    %26 = arith.addf %21, %25 : vector<8x384xf32>
    %c5 = arith.constant 5 : index
    %c0_18 = arith.constant 0 : index
    %c0_19 = arith.constant 0 : index
    %27 = vector.load %arg3[%c5, %c0_18, %c0_19] : memref<9x8x4xf32, #tpu.memory_space<vmem>>, vector<1x8x4xf32>
    %28 = vector.shape_cast %27 : vector<1x8x4xf32> to vector<8x4xf32>
    %cst_20 = arith.constant dense<0.000000e+00> : vector<8x384xf32>
    %29 = tpu.matmul %28, %1, %cst_20 {dimension_numbers = #tpu.dot_dimension_numbers<[1], [0], [0], [1], [0, 0, 1, 1], [], []>} : vector<8x4xf32>, vector<4x384xf32>, vector<8x384xf32> -> vector<8x384xf32>
    %c364_i32 = arith.constant 364 : i32
    %30 = tpu.dynamic_rotate %29 by %c364_i32 dim 1 : vector<8x384xf32>, i32 -> vector<8x384xf32>
    %31 = arith.addf %26, %30 : vector<8x384xf32>
    %c6 = arith.constant 6 : index
    %c0_21 = arith.constant 0 : index
    %c0_22 = arith.constant 0 : index
    %32 = vector.load %arg3[%c6, %c0_21, %c0_22] : memref<9x8x4xf32, #tpu.memory_space<vmem>>, vector<1x8x4xf32>
    %33 = vector.shape_cast %32 : vector<1x8x4xf32> to vector<8x4xf32>
    %cst_23 = arith.constant dense<0.000000e+00> : vector<8x384xf32>
    %34 = tpu.matmul %33, %1, %cst_23 {dimension_numbers = #tpu.dot_dimension_numbers<[1], [0], [0], [1], [0, 0, 1, 1], [], []>} : vector<8x4xf32>, vector<4x384xf32>, vector<8x384xf32> -> vector<8x384xf32>
    %c348_i32 = arith.constant 348 : i32
    %35 = tpu.dynamic_rotate %34 by %c348_i32 dim 1 : vector<8x384xf32>, i32 -> vector<8x384xf32>
    %36 = arith.addf %31, %35 : vector<8x384xf32>
    %c7 = arith.constant 7 : index
    %c0_24 = arith.constant 0 : index
    %c0_25 = arith.constant 0 : index
    %37 = vector.load %arg3[%c7, %c0_24, %c0_25] : memref<9x8x4xf32, #tpu.memory_space<vmem>>, vector<1x8x4xf32>
    %38 = vector.shape_cast %37 : vector<1x8x4xf32> to vector<8x4xf32>
    %cst_26 = arith.constant dense<0.000000e+00> : vector<8x384xf32>
    %39 = tpu.matmul %38, %1, %cst_26 {dimension_numbers = #tpu.dot_dimension_numbers<[1], [0], [0], [1], [0, 0, 1, 1], [], []>} : vector<8x4xf32>, vector<4x384xf32>, vector<8x384xf32> -> vector<8x384xf32>
    %c347_i32 = arith.constant 347 : i32
    %40 = tpu.dynamic_rotate %39 by %c347_i32 dim 1 : vector<8x384xf32>, i32 -> vector<8x384xf32>
    %41 = arith.addf %36, %40 : vector<8x384xf32>
    %c8 = arith.constant 8 : index
    %c0_27 = arith.constant 0 : index
    %c0_28 = arith.constant 0 : index
    %42 = vector.load %arg3[%c8, %c0_27, %c0_28] : memref<9x8x4xf32, #tpu.memory_space<vmem>>, vector<1x8x4xf32>
    %43 = vector.shape_cast %42 : vector<1x8x4xf32> to vector<8x4xf32>
    %cst_29 = arith.constant dense<0.000000e+00> : vector<8x384xf32>
    %44 = tpu.matmul %43, %1, %cst_29 {dimension_numbers = #tpu.dot_dimension_numbers<[1], [0], [0], [1], [0, 0, 1, 1], [], []>} : vector<8x4xf32>, vector<4x384xf32>, vector<8x384xf32> -> vector<8x384xf32>
    %c346_i32 = arith.constant 346 : i32
    %45 = tpu.dynamic_rotate %44 by %c346_i32 dim 1 : vector<8x384xf32>, i32 -> vector<8x384xf32>
    %46 = arith.addf %41, %45 : vector<8x384xf32>
    %c0_30 = arith.constant 0 : index
    %c0_31 = arith.constant 0 : index
    %47 = vector.load %arg4[%c0_30, %c0_31] : memref<8x1xf32, #tpu.memory_space<vmem>>, vector<8x1xf32>
    %48 = vector.broadcast %47 : vector<8x1xf32> to vector<8x384xf32>
    %49 = arith.addf %46, %48 : vector<8x384xf32>
    %c0_32 = arith.constant 0 : index
    %c0_33 = arith.constant 0 : index
    %c0_34 = arith.constant 0 : index
    %50 = vector.load %arg5[%c0_32, %c0_33, %c0_34] : memref<1x8x384xf32, #tpu.memory_space<vmem>>, vector<1x8x384xf32>
    %51 = vector.shape_cast %50 : vector<1x8x384xf32> to vector<8x384xf32>
    %52 = vector.shape_cast %49 : vector<8x384xf32> to vector<1x8x384xf32>
    tpu.vector_store %arg5[%c0_32, %c0_33, %c0_34], %52 {strides = array<i32>} : memref<1x8x384xf32, #tpu.memory_space<vmem>>, vector<1x8x384xf32>,
    return
  }
  func.func @transform_0(%arg0: i32, %arg1: i32) -> (i32, i32, i32) {
    %c0_i32 = arith.constant 0 : i32
    %c0_i32_0 = arith.constant 0 : i32
    %c0_i32_1 = arith.constant 0 : i32
    return %arg0, %c0_i32, %c0_i32_0 : i32, i32, i32
  }
  func.func @transform_1(%arg0: i32, %arg1: i32) -> (i32, i32, i32) {
    %c0_i32 = arith.constant 0 : i32
    %c0_i32_0 = arith.constant 0 : i32
    %c0_i32_1 = arith.constant 0 : i32
    return %c0_i32, %arg1, %c0_i32_0 : i32, i32, i32
  }
  func.func @transform_2(%arg0: i32, %arg1: i32) -> (i32, i32) {
    %c0_i32 = arith.constant 0 : i32
    %c0_i32_0 = arith.constant 0 : i32
    return %arg1, %c0_i32 : i32, i32
  }
  func.func @transform_3(%arg0: i32, %arg1: i32) -> (i32, i32, i32) {
    %c0_i32 = arith.constant 0 : i32
    %c0_i32_0 = arith.constant 0 : i32
    return %arg0, %arg1, %c0_i32 : i32, i32, i32
  }
}

</mosaic_0001>

<bundles_post_ra>
// kernel: tpu_custom_call.1
= control target key start
LH: loop header
LB: loop body
LE: loop exit
PB: predicated region body
PF: predicated region fallthrough
CT: control target
= control target key end

     0   :  { %8 = vsyncpa [#allocation3], 0  ;;  %s2399_s0 = inlined_call_operand.vmem [shape: f32[2,4,384], index: 0, kind: input, shape index: {}]   ;;  %s2400_s1 = inlined_call_operand.vmem [shape: f32[9,8,4], index: 1, kind: input, shape index: {}]   ;;  %s2401_s2 = inlined_call_operand.vmem [shape: f32[8,1], index: 2, kind: input, shape index: {}]   ;;  %s2402_s3 = inlined_call_operand.hbm [shape: f32[2,8,384], index: 3, kind: output, shape index: {}]  }
   0x1   :  { %10 = vsyncpa [#allocation3 + $0x1], 0  ;;  %s2084_s12 = smov 0   ;;  %s2086_s13 = smov 0  }
   0x2   :  { %s2088_s14 = smov 0   ;;  %s2090_s15 = smov 0  }
   0x3   :  { %s2092_s16 = smov 0   ;;  %s2094_s17 = smov 0  }
   0x4 LB: > { %s1775_s18 = sadd.s32 4294967295, %s2050_s17   ;;  %s1776_s19 = sadd.s32 4294967294, %s2050_s17   ;;  %s2050_s17 = sphi %s2094_s17, %s16_s17   ;;  %s2046_s16 = sphi %s2092_s16, %s2409_s16   ;;  %s2042_s15 = sphi %s2090_s15, %s2408_s15   ;;  %s2038_s14 = sphi %s2088_s14, %s2407_s14   ;;  %s2034_s13 = sphi %s2086_s13, %s2406_s13   ;;  %s2030_s12 = sphi %s2084_s12, %s2405_s12  }
   0x5   : > { %s28_s20 = sadd.s32 1, %s2046_s16  ;;  %s115_s21 = sadd.s32 1, %s2038_s14 }
   0x6   : > { %p30_p0 = scmp.ge.s32.totalorder %s28_s20, 2  ;;  %p125_p1 = scmp.ne.s32.totalorder %s2038_s14, %s2034_s13 }
   0x7   : > { %p126_p2 = scmp.eq.s32.totalorder %s1775_s18, 1  ;;  %p131_p3 = scmp.ne.s32.totalorder %s2034_s13, %s2030_s12 }
   0x8   : > { %s2411_s20 = smov (%p30_p0, %s28_s20), 0  ;;  %p132_p5 = scmp.eq.s32.totalorder %s1776_s19, 1 }
   0x9   : > { %p2124_p4 = por %p126_p2, %p125_p1  ;;  %s110_s23 = ssub.s32 %s2046_s16, %s2411_s20 }
   0xa   : > { %p1781_p6 = scmp.ge.s32.totalorder %s2050_s17, 1  ;;  %p113_p7 = scmp.eq.s32.totalorder %s110_s23, 0 }
   0xb   : > { %p2131_p8 = por %p132_p5, %p131_p3  ;;  %p172_p9 = scmp.lt.s32.totalorder %s2050_s17, 3 }
   0xc   : > { %s2137_s25 = scalar_select %p113_p7, %s2038_s14, %s115_s21  }
   0xd   : > { %p173_p10 = pnand %p1781_p6, %p172_p9 }
   0xe   : > { %p204_p11 = scmp.lt.s32.totalorder (!%p173_p10), %s2042_s15, 1  ;;  %s2055_s7 = smov (!%p173_p10), 127  }
   0xf   : > { %176 = sbr.rel (%p173_p10) target bundleno = 405 (0x195), region = 32  ;;  %s2056_s8 = smov (!%p173_p10), 126  }
  0x10   : > { %s2057_s9 = smov (!%p173_p10), 110   ;;  %s2058_s10 = smov (!%p173_p10), 109  }
  0x11   : > { %s2059_s11 = smov (!%p173_p10), 108   ;;  %s2060_s18 = smov (!%p173_p10), 92  }
  0x12   : > { %s2061_s19 = smov (!%p173_p10), 91   ;;  %s2062_s21 = smov (!%p173_p10), 90  }
  0x13   : > { %s201_s23 = sand.u32 (!%p173_p10), 1, %s2034_s13   ;;  %s1904_s27 = smul.u32 (!%p173_p10), 384, %s2042_s15 }
  0x14   : > { %v2052_v0 = vmov 0.0   ;;  %vm2053_vm0 = vmmov 0   ;;  %s205_s26 = scalar_select %p204_p11, %s2042_s15, 1  ;;  %v2054_v1 = vmov 0   ;;  %v1646_v2 = vld [vmem:[%s2401_s2] sm:$0xff]  ;;  %vm229_vm1 = vcmask 1043456  }
  0x15   : > { %1857 = vmatprep.subr.mxu1 %v2052_v0  ;;  %1859 = vmatprep.mubr.msk.f32.mxu1 %vm2053_vm0, %v2052_v0  ;;  %v1783_v3 = vld [vmem:[%s2400_s1 + $0x8] sm:$0xff]  ;;  %vm225_vm2 = vcmask 31744   ;;  %v219_v7 = vld [vmem:[%s2400_s1] sm:$0xff]  ;;  %v1794_v8 = vld [vmem:[%s2400_s1 + $0x10] sm:$0xff]  ;;  %v383_v62 = vlaneseq  ;;  %s2357_s15 = scalar_lea.hbm %s2402_s3, %s1904_s27 }
  0x16   : > { %300 = vmatprep.mubr.f32.mxu0 %v2052_v0  ;;  %1971 = vset.pattern.permute.xlu1 %v2054_v1  ;;  %s1903_s29 = smul.u32 12, %s205_s26  ;;  %v1800_v9 = vld [vmem:[%s2400_s1 + $0x18] sm:$0xff]  ;;  %v1806_v10 = vld [vmem:[%s2400_s1 + $0x20] sm:$0xff]  ;;  %v1812_v11 = vld [vmem:[%s2400_s1 + $0x28] sm:$0xff] }
  0x17   : > { %1972 = vset.pattern.permute.xlu0 %v2054_v1  ;;  %1649 = vperm.xlu1 %1971, %v1646_v2   ;;  %v1818_v12 = vld [vmem:[%s2400_s1 + $0x30] sm:$0xff]  ;;  %v1824_v13 = vld [vmem:[%s2400_s1 + $0x38] sm:$0xff]  ;;  %v1830_v14 = vld [vmem:[%s2400_s1 + $0x40] sm:$0xff]  ;;  %v2298_v1 = vand.u32 127, %v383_v62  ;;  %s1902_s26 = smul.u32 24, %s201_s23 }
  0x18   : > { %s208_s5 = scalar_lea.vmem %s2399_s0, %s1903_s29 }
  0x19   : > { %v2154_v4 = vld [vmem:[%s208_s5] sm:$0xff]  ;;  %v2156_v5 = vld [vmem:[%s208_s5 + $0x8] sm:$0xf]  ;;  %vm385_vm3 = vcmp.lt.s32.totalorder %v2298_v1, 127  ;;  %vm685_vm4 = vcmp.lt.s32.totalorder %v2298_v1, 126  ;;  %vm844_vm5 = vcmp.lt.s32.totalorder %v2298_v1, 110 }
  0x1a   : > { %1858 = vmatpush3.msk.msra.mxu1 %vm229_vm1, %v2156_v5  ;;  %v2162_v6 = vcombine.high %v2154_v4, %v2154_v4  ;;  %vm1003_vm6 = vcmp.lt.s32.totalorder %v2298_v1, 109  ;;  %vm1162_vm7 = vcmp.lt.s32.totalorder %v2298_v1, 108  ;;  %vm1321_vm8 = vcmp.lt.s32.totalorder %v2298_v1, 92  ;;  %s203_s28 = scalar_lea.vmem [#allocation2], %s1902_s26  ;;  %s1659_s5 = scalar_lea.sflag [#allocation3], %s201_s23 }
  0x1b   : > { %1860 = vmatmul.mubr.msk.f32.vlgmr.msra.gmra.mxu1 %vm225_vm2, %v1783_v3  ;;  %1862 = vmatprep.subr.mxu1 %v2052_v0  ;;  %vm1480_vm9 = vcmp.lt.s32.totalorder %v2298_v1, 91  ;;  %vm1639_vm10 = vcmp.lt.s32.totalorder %v2298_v1, 90  ;;  %s1675_s29 = sshll.u32 %s203_s28, 4  ;;  %s1676_s29 = int_to_ptr.vmem [resolvable:$true] %s1675_s29 }
  0x1c   : > { %1784 = vmatprep.subr.msk.mxu0 %vm229_vm1, %v2162_v6  ;;  %1863 = vmatpush3.msk.msra.mxu1 %vm229_vm1, %v2156_v5  ;;  %s1974_s6 = scalar_lea.vmem %s1676_s29, 384 }
  0x1d   : > { %1785 = vmatpush1.msk.msra.mxu0 %vm229_vm1, %v2154_v4  ;;  %1864 = vmatprep.mubr.msk.f32.mxu1 %vm2053_vm0, %v2052_v0  ;;  %p1975_p12 = scmp.ne.s32.totalorder %s1676_s29, %s1974_s6 }
  0x1e   : > { %1786 = vmatmul.mubr.msk.f32.vlgmr.msra.gmra.mxu0 %vm225_vm2, %v1783_v3  ;;  %1867 = vmatprep.subr.mxu1 %v2052_v0 }
  0x1f   : > { %1865 = vmatmul.mubr.msk.f32.vlgmr.msra.gmra.mxu1 %vm225_vm2, %v219_v7  ;;  %1789 = vmatprep.subr.msk.mxu0 %vm229_vm1, %v2162_v6  ;;  %p1976_p13 = pnand %p1975_p12, %p2124_p4 }
  0x20   : > { %1868 = vmatpush3.msk.msra.mxu1 %vm229_vm1, %v2156_v5  ;;  %1790 = vmatpush1.msk.msra.mxu0 %vm229_vm1, %v2154_v4 }
  0x21   : > { %456 = vmatprep.mubr.f32.mxu0 %v2052_v0  ;;  %1869 = vmatprep.mubr.msk.f32.mxu1 %vm2053_vm0, %v2052_v0  ;;  %p1977_p0 = pneg %p1976_p13 }
  0x22   : > { %1791 = vmatmul.mubr.msk.f32.vlgmr.msra.gmra.mxu0 %vm225_vm2, %v219_v7  ;;  %1872 = vmatprep.subr.mxu1 %v2052_v0 }
  0x23   : > { %1870 = vmatmul.mubr.msk.f32.vlgmr.msra.gmra.mxu1 %vm225_vm2, %v1794_v8  ;;  %1795 = vmatprep.subr.msk.mxu0 %vm229_vm1, %v2162_v6 }
  0x24   : > { %1873 = vmatpush3.msk.msra.mxu1 %vm229_vm1, %v2156_v5  ;;  %1796 = vmatpush1.msk.msra.mxu0 %vm229_vm1, %v2154_v4 }
  0x25   : > { %602 = vmatprep.mubr.f32.mxu0 %v2052_v0  ;;  %1874 = vmatprep.mubr.msk.f32.mxu1 %vm2053_vm0, %v2052_v0 }
  0x26   : > { %1797 = vmatmul.mubr.msk.f32.vlgmr.msra.gmra.mxu0 %vm225_vm2, %v1794_v8  ;;  %1877 = vmatprep.subr.mxu1 %v2052_v0 }
  0x27   : > { %1875 = vmatmul.mubr.msk.f32.vlgmr.msra.gmra.mxu1 %vm225_vm2, %v1800_v9  ;;  %1801 = vmatprep.subr.msk.mxu0 %vm229_vm1, %v2162_v6 }
  0x28   : > { %1878 = vmatpush3.msk.msra.mxu1 %vm229_vm1, %v2156_v5  ;;  %1879 = vmatprep.mubr.msk.f32.mxu1 %vm2053_vm0, %v2052_v0 }
  0x29   : > { %1802 = vmatpush1.msk.msra.mxu0 %vm229_vm1, %v2154_v4  ;;  %761 = vmatprep.mubr.f32.mxu0 %v2052_v0 }
  0x2a   : > { %1803 = vmatmul.mubr.msk.f32.vlgmr.msra.gmra.mxu0 %vm225_vm2, %v1800_v9  ;;  %1882 = vmatprep.subr.mxu1 %v2052_v0 }
  0x2b   : > { %1880 = vmatmul.mubr.msk.f32.vlgmr.msra.gmra.mxu1 %vm225_vm2, %v1806_v10  ;;  %1807 = vmatprep.subr.msk.mxu0 %vm229_vm1, %v2162_v6 }
  0x2c   : > { %1883 = vmatpush3.msk.msra.mxu1 %vm229_vm1, %v2156_v5  ;;  %1884 = vmatprep.mubr.msk.f32.mxu1 %vm2053_vm0, %v2052_v0 }
  0x2d   : > { %1808 = vmatpush1.msk.msra.mxu0 %vm229_vm1, %v2154_v4  ;;  %920 = vmatprep.mubr.f32.mxu0 %v2052_v0 }
  0x2e   : > { %1809 = vmatmul.mubr.msk.f32.vlgmr.msra.gmra.mxu0 %vm225_vm2, %v1806_v10  ;;  %1887 = vmatprep.subr.mxu1 %v2052_v0 }
  0x2f   : > { %1885 = vmatmul.mubr.msk.f32.vlgmr.msra.gmra.mxu1 %vm225_vm2, %v1812_v11  ;;  %1813 = vmatprep.subr.msk.mxu0 %vm229_vm1, %v2162_v6 }
  0x30   : > { %1888 = vmatpush3.msk.msra.mxu1 %vm229_vm1, %v2156_v5  ;;  %1889 = vmatprep.mubr.msk.f32.mxu1 %vm2053_vm0, %v2052_v0 }
  0x31   : > { %1814 = vmatpush1.msk.msra.mxu0 %vm229_vm1, %v2154_v4  ;;  %1079 = vmatprep.mubr.f32.mxu0 %v2052_v0 }
  0x32   : > { %1815 = vmatmul.mubr.msk.f32.vlgmr.msra.gmra.mxu0 %vm225_vm2, %v1812_v11  ;;  %1819 = vmatprep.subr.msk.mxu0 %vm229_vm1, %v2162_v6 }
  0x33   : > { %1890 = vmatmul.mubr.msk.f32.vlgmr.msra.gmra.mxu1 %vm225_vm2, %v1818_v12  ;;  %1892 = vmatprep.subr.mxu1 %v2052_v0 }
  0x34   : > { %1820 = vmatpush1.msk.msra.mxu0 %vm229_vm1, %v2154_v4  ;;  %1238 = vmatprep.mubr.f32.mxu0 %v2052_v0 }
  0x35   : > { %1893 = vmatpush3.msk.msra.mxu1 %vm229_vm1, %v2156_v5  ;;  %1894 = vmatprep.mubr.msk.f32.mxu1 %vm2053_vm0, %v2052_v0 }
  0x36   : > { %1821 = vmatmul.mubr.msk.f32.vlgmr.msra.gmra.mxu0 %vm225_vm2, %v1818_v12  ;;  %1825 = vmatprep.subr.msk.mxu0 %vm229_vm1, %v2162_v6 }
  0x37   : > { %1895 = vmatmul.mubr.msk.f32.vlgmr.msra.gmra.mxu1 %vm225_vm2, %v1824_v13  ;;  %1826 = vmatpush1.msk.msra.mxu0 %vm229_vm1, %v2154_v4 }
  0x38   : > { %1397 = vmatprep.mubr.f32.mxu0 %v2052_v0  ;;  %1831 = vmatprep.subr.msk.mxu0 %vm229_vm1, %v2162_v6 }
  0x39   : > { %1897 = vmatprep.subr.mxu1 %v2052_v0  ;;  %1899 = vmatprep.mubr.msk.f32.mxu1 %vm2053_vm0, %v2052_v0 }
  0x3a   : > { %1827 = vmatmul.mubr.msk.f32.vlgmr.msra.gmra.mxu0 %vm225_vm2, %v1824_v13  ;;  %1898 = vmatpush3.msk.msra.mxu1 %vm229_vm1, %v2156_v5 }
  0x3b   : > { %1832 = vmatpush1.msk.msra.mxu0 %vm229_vm1, %v2154_v4  ;;  %1556 = vmatprep.mubr.f32.mxu0 %v2052_v0 }
  0x3c   : > { %1900 = vmatmul.mubr.msk.f32.vlgmr.msra.gmra.mxu1 %vm225_vm2, %v1830_v14 }
  0x3e   : > { %1833 = vmatmul.mubr.msk.f32.vlgmr.msra.gmra.mxu0 %vm225_vm2, %v1830_v14 }
  0x92   : > { %v2296_v51 = vpop.permute.xlu1 %1649 }
  0xdb   : > { %v373_v15 = vpop.f32.mrf.mxu1 }
  0xdc   : > { %381 = vrot.lane.b32.xlu1 %v373_v15, %s2055_s7 }
  0xdd   : > { %v1861_v16 = vpop.f32.mrf.mxu1 }
  0xde   : > { %v302_v17 = vpop.f32.mrf.mxu0 }
  0xdf   : > { %v2290_v18 = vpop.f32.mrf.mxu1  ;;  %377 = vrot.lane.b32.xlu0 %v302_v17, %s2055_s7 }
  0xe0   : > { %v304_v19 = vpop.f32.mrf.mxu0 }
  0xe1   : > { %v1866_v20 = vpop.f32.mrf.mxu1 }
  0xe2   : > { %v2292_v21 = vpop.f32.mrf.mxu0 }
  0xe3   : > { %v675_v22 = vpop.f32.mrf.mxu1  ;;  %379 = vrot.lane.b32.xlu0 %v304_v19, %s2055_s7  ;;  %s2063_s7 = smov [#allocation2]  }
  0xe4   : > { %683 = vrot.lane.b32.xlu1 %v675_v22, %s2056_s8  ;;  %v2294_v23 = vpop.f32.mrf.mxu0 }
  0xe5   : > { %v1871_v24 = vpop.f32.mrf.mxu1 }
  0xe6   : > { %v604_v25 = vpop.f32.mrf.mxu0 }
  0xe7   : > { %v834_v26 = vpop.f32.mrf.mxu1 }
  0xe8   : > { %842 = vrot.lane.b32.xlu0 %v834_v26, %s2057_s9  ;;  %679 = vrot.lane.b32.xlu1 %v604_v25, %s2056_s8  ;;  %v606_v27 = vpop.f32.mrf.mxu0 }
  0xe9   : > { %v1876_v28 = vpop.f32.mrf.mxu1 }
  0xea   : > { %v763_v29 = vpop.f32.mrf.mxu0 }
  0xeb   : > { %v993_v30 = vpop.f32.mrf.mxu1 }
  0xec   : > { %1001 = vrot.lane.b32.xlu1 %v993_v30, %s2058_s10  ;;  %681 = vrot.lane.b32.xlu0 %v606_v27, %s2056_s8  ;;  %v765_v31 = vpop.f32.mrf.mxu0  ;;  %s1978_s8 = sshll.u32 %s2063_s7, 4  ;;  %s1979_s8 = int_to_ptr.vmem [resolvable:$false] %s1978_s8 }
  0xed   : > { %v1881_v32 = vpop.f32.mrf.mxu1  ;;  %p1981_p1 = scmp.lt.s32.totalorder %s1676_s29, %s1979_s8 }
  0xee   : > { %v922_v33 = vpop.f32.mrf.mxu0 }
  0xef   : > { %v1152_v34 = vpop.f32.mrf.mxu1 }
  0xf0   : > { %838 = vrot.lane.b32.xlu0 %v763_v29, %s2057_s9  ;;  %840 = vrot.lane.b32.xlu1 %v765_v31, %s2057_s9  ;;  %v924_v35 = vpop.f32.mrf.mxu0  ;;  %s1980_s9 = scalar_lea.vmem %s1979_s8, 768 }
  0xf1   : > { %v1886_v36 = vpop.f32.mrf.mxu1  ;;  %p1982_p2 = scmp.lt.s32.totalorder %s1980_s9, %s1974_s6 }
  0xf2   : > { %v1081_v37 = vpop.f32.mrf.mxu0 }
  0xf3   : > { %v1311_v38 = vpop.f32.mrf.mxu1  ;;  %p1983_p3 = por %p1982_p2, %p1981_p1 }
  0xf4   : > { %1160 = vrot.lane.b32.xlu0 %v1152_v34, %s2059_s11  ;;  %997 = vrot.lane.b32.xlu1 %v922_v33, %s2058_s10  ;;  %v1083_v39 = vpop.f32.mrf.mxu0 }
  0xf5   : > { %v1891_v40 = vpop.f32.mrf.mxu1  ;;  %p1984_p5 = pnand %p1983_p3, %p1977_p0 }
  0xf6   : > { %v1240_v41 = vpop.f32.mrf.mxu0 }
  0xf7   : > { %v1470_v42 = vpop.f32.mrf.mxu1 }
  0xf8   : > { %1319 = vrot.lane.b32.xlu1 %v1311_v38, %s2060_s18  ;;  %999 = vrot.lane.b32.xlu0 %v924_v35, %s2058_s10  ;;  %v1242_v43 = vpop.f32.mrf.mxu0 }
  0xf9   : > { %v1896_v44 = vpop.f32.mrf.mxu1 }
  0xfa   : > { %v1399_v45 = vpop.f32.mrf.mxu0 }
  0xfc   : > { %1156 = vrot.lane.b32.xlu0 %v1081_v37, %s2059_s11  ;;  %1158 = vrot.lane.b32.xlu1 %v1083_v39, %s2059_s11  ;;  %v1629_v46 = vpop.f32.mrf.mxu1  ;;  %v1401_v48 = vpop.f32.mrf.mxu0 }
  0xfe   : > { %v1901_v47 = vpop.f32.mrf.mxu1  ;;  %v1558_v49 = vpop.f32.mrf.mxu0 }
 0x100   : > { %1478 = vrot.lane.b32.xlu0 %v1470_v42, %s2061_s19  ;;  %1315 = vrot.lane.b32.xlu1 %v1240_v41, %s2060_s18  ;;  %v1560_v50 = vpop.f32.mrf.mxu0 }
 0x104   : > { %1317 = vrot.lane.b32.xlu0 %v1242_v43, %s2060_s18  ;;  %1476 = vrot.lane.b32.xlu1 %v1401_v48, %s2061_s19 }
 0x108   : > { %1474 = vrot.lane.b32.xlu0 %v1399_v45, %s2061_s19  ;;  %1635 = vrot.lane.b32.xlu1 %v1560_v50, %s2062_s21 }
 0x10c   : > { %1633 = vrot.lane.b32.xlu0 %v1558_v49, %s2062_s21 }
 0x110   : > { %1637 = vrot.lane.b32.xlu0 %v1629_v46, %s2062_s21 }
 0x14e   : > { %v382_v53 = vpop.permute.xlu1 %381 }
 0x151   : > { %v378_v52 = vpop.permute.xlu0 %377 }
 0x152   : > { %v388_v12 = vsel %vm385_vm3, %v382_v53, %v378_v52 }
 0x155   : > { %v380_v54 = vpop.permute.xlu0 %379 }
 0x156   : > { %v684_v55 = vpop.permute.xlu1 %683  ;;  %v387_v6 = vsel %vm385_vm3, %v378_v52, %v380_v54  ;;  %v386_v7 = vsel %vm385_vm3, %v380_v54, %v382_v53 }
 0x157   : > { %v459_v9 = vadd.f32 %v2292_v21, %v387_v6  ;;  %v461_v15 = vadd.f32 %v2294_v23, %v386_v7  ;;  %v530_v21 = vadd.f32 %v2290_v18, %v388_v12 }
 0x15a   : > { %v843_v56 = vpop.permute.xlu0 %842  ;;  %v680_v57 = vpop.permute.xlu1 %679 }
 0x15b   : > { %v688_v17 = vsel %vm685_vm4, %v684_v55, %v680_v57 }
 0x15c   : > { %v691_v28 = vadd.f32 %v688_v17, %v530_v21 }
 0x15e   : > { %v1002_v58 = vpop.permute.xlu1 %1001  ;;  %v682_v59 = vpop.permute.xlu0 %681 }
 0x15f   : > { %v687_v8 = vsel %vm685_vm4, %v680_v57, %v682_v59  ;;  %v686_v13 = vsel %vm685_vm4, %v682_v59, %v684_v55 }
 0x160   : > { %v689_v16 = vadd.f32 %v687_v8, %v459_v9  ;;  %v690_v22 = vadd.f32 %v686_v13, %v461_v15 }
 0x162   : > { %v839_v60 = vpop.permute.xlu0 %838  ;;  %v841_v61 = vpop.permute.xlu1 %840 }
 0x163   : > { %v846_v14 = vsel %vm844_vm5, %v839_v60, %v841_v61  ;;  %v845_v19 = vsel %vm844_vm5, %v841_v61, %v843_v56  ;;  %v847_v23 = vsel %vm844_vm5, %v843_v56, %v839_v60 }
 0x164   : > { %v848_v24 = vadd.f32 %v846_v14, %v689_v16  ;;  %v849_v29 = vadd.f32 %v845_v19, %v690_v22  ;;  %v850_v34 = vadd.f32 %v847_v23, %v691_v28 }
 0x166   : > { %v1161_v63 = vpop.permute.xlu0 %1160  ;;  %v998_v0 = vpop.permute.xlu1 %997 }
 0x167   : > { %v1006_v18 = vsel %vm1003_vm6, %v1002_v58, %v998_v0 }
 0x168   : > { %v1009_v41 = vadd.f32 %v1006_v18, %v850_v34 }
 0x16a   : > { %v1320_v2 = vpop.permute.xlu1 %1319  ;;  %v1000_v3 = vpop.permute.xlu0 %999 }
 0x16b   : > { %v1005_v20 = vsel %vm1003_vm6, %v998_v0, %v1000_v3  ;;  %v1004_v26 = vsel %vm1003_vm6, %v1000_v3, %v1002_v58 }
 0x16c   : > { %v1007_v30 = vadd.f32 %v1005_v20, %v848_v24  ;;  %v1008_v35 = vadd.f32 %v1004_v26, %v849_v29 }
 0x16e   : > { %v1157_v4 = vpop.permute.xlu0 %1156  ;;  %v1159_v5 = vpop.permute.xlu1 %1158 }
 0x16f   : > { %v1164_v27 = vsel %vm1162_vm7, %v1157_v4, %v1159_v5  ;;  %v1163_v32 = vsel %vm1162_vm7, %v1159_v5, %v1161_v63  ;;  %v1165_v38 = vsel %vm1162_vm7, %v1161_v63, %v1157_v4 }
 0x170   : > { %v1166_v36 = vadd.f32 %v1164_v27, %v1007_v30  ;;  %v1167_v42 = vadd.f32 %v1163_v32, %v1008_v35  ;;  %v1168_v46 = vadd.f32 %v1165_v38, %v1009_v41 }
 0x172   : > { %v1479_v10 = vpop.permute.xlu0 %1478  ;;  %v1316_v11 = vpop.permute.xlu1 %1315 }
 0x173   : > { %v1324_v45 = vsel %vm1321_vm8, %v1320_v2, %v1316_v11 }
 0x174   : > { %v1327_v53 = vadd.f32 %v1324_v45, %v1168_v46 }
 0x176   : > { %v1318_v25 = vpop.permute.xlu0 %1317  ;;  %v1477_v31 = vpop.permute.xlu1 %1476 }
 0x177   : > { %v1323_v33 = vsel %vm1321_vm8, %v1316_v11, %v1318_v25  ;;  %v1322_v39 = vsel %vm1321_vm8, %v1318_v25, %v1320_v2  ;;  %v1481_v55 = vsel %vm1480_vm9, %v1477_v31, %v1479_v10 }
 0x178   : > { %v1325_v43 = vadd.f32 %v1323_v33, %v1166_v36  ;;  %v1326_v47 = vadd.f32 %v1322_v39, %v1167_v42 }
 0x17a   : > { %v1475_v37 = vpop.permute.xlu0 %1474  ;;  %v1636_v44 = vpop.permute.xlu1 %1635  ;;  %v1485_v56 = vadd.f32 %v1481_v55, %v1326_v47 }
 0x17b   : > { %v1482_v40 = vsel %vm1480_vm9, %v1475_v37, %v1477_v31  ;;  %v1483_v50 = vsel %vm1480_vm9, %v1479_v10, %v1475_v37 }
 0x17c   : > { %v1484_v48 = vadd.f32 %v1482_v40, %v1325_v43  ;;  %v1486_v57 = vadd.f32 %v1483_v50, %v1327_v53 }
 0x17e   : > { %v1634_v49 = vpop.permute.xlu0 %1633 }
 0x17f   : > { %v1641_v52 = vsel %vm1639_vm10, %v1634_v49, %v1636_v44 }
 0x180   : > { %v1643_v54 = vadd.f32 %v1641_v52, %v1484_v48 }
 0x182   : > { %v1652_v58 = vadd.f32 %v2296_v51, %v1643_v54  ;;  %v1638_v59 = vpop.permute.xlu0 %1637 }
 0x183   : > { %v1640_v60 = vsel %vm1639_vm10, %v1636_v44, %v1638_v59  ;;  %v1642_v61 = vsel %vm1639_vm10, %v1638_v59, %v1634_v49 }
 0x184   : > { %1655 = vst [vmem:[%s203_s28] sm:$0xff] %v1652_v58  ;;  %v1644_v62 = vadd.f32 %v1640_v60, %v1485_v56  ;;  %v1645_v63 = vadd.f32 %v1642_v61, %v1486_v57 }
 0x186   : > { %v1653_v0 = vadd.f32 %v2296_v51, %v1644_v62  ;;  %v1654_v2 = vadd.f32 %v2296_v51, %v1645_v63 }
 0x188   : > { %1656 = vst [vmem:[%s203_s28 + $0x8] sm:$0xff] %v1653_v0  ;;  %1657 = vst [vmem:[%s203_s28 + $0x10] sm:$0xff] %v1654_v2 }
 0x189   : > { %1987 = shalt.err (!%p1984_p5)
}
 0x18a   : > { %s1988_s10 = scalar_lea.hbm %s2357_s15, 384  ;;  %s1992_s19 = scalar_lea.hbm %s2402_s3, 768 }
 0x18b   : > { %p1989_p6 = scmp.ne.s32.totalorder %s2357_s15, %s1988_s10  ;;  %p1993_p10 = scmp.lt.s32.totalorder %s2357_s15, %s2402_s3 }
 0x18c   : > { %p1994_p11 = scmp.lt.s32.totalorder %s1992_s19, %s1988_s10 }
 0x18d   : > { %p1990_p7 = pnand %p1989_p6, %p2124_p4 }
 0x18e   : > { %p1995_p12 = por %p1994_p11, %p1993_p10 }
 0x18f   : > { %p1991_p9 = pneg %p1990_p7 }
 0x191   : > { %p1996_p13 = pnand %p1995_p12, %p1991_p9 }
 0x193   : > { %1999 = shalt.err (!%p1996_p13)
}
 0x194   : > { %1905 = dma.vmem_to_hbm [thread:$0]  (%p2124_p4), %s1676_s29, 384, %s2357_s15, %s1659_s5  }
 0x195 PF: > { %p1911_p0 = scmp.ge.s32.totalorder %s2050_s17, 2  ;;  %s1687_s26 = sand.u32 1, %s2030_s12  }
 0x196   : > { %s1688_s27 = scalar_lea.sflag [#allocation3], %s1687_s26 }
 0x197   : > { %p1908_p1 = pnand %p1911_p0, %p2131_p8 }
 0x199   : > { %p1909_p2 = pneg %p1908_p1 }
 0x19b   : > { %2025 = dma.done.wait (%p1909_p2), %s1688_s27, 384  }
 0x19c   : > { %2027 = vsyncadd (%p1909_p2), %s1688_s27, 4294966912  ;;  %s16_s17 = sadd.s32 1, %s2050_s17   ;;  %s2405_s12 = smov %s2034_s13 }
 0x19d   : > { %p13_p3 = scmp.ge.s32.totalorder %s16_s17, 4   ;;  %s2406_s13 = smov %s2038_s14 }
 0x19e   : > { %s2407_s14 = smov %s2137_s25  ;;  %s2408_s15 = smov %s2046_s16 }
 0x19f   : > { %s2409_s16 = smov %s2411_s20  ;;  %15 = sbr.rel (!%p13_p3) target bundleno = 4 (0x4), region = 81 }
 0x1a4   :  { %1693 = vsyncpa [#allocation3], 1 }
 0x1a5   :  { %1695 = vsyncpa [#allocation3 + $0x1], 1 }

</bundles_post_ra>
